<compile_context>
chip_gen: v7x
topology: tpu7x:2x2x1
jax: 0.10.0
libtpu: 0.0.40
codegen_flags: <defaults>
</compile_context>

<pallas_src>
import math

import numpy as np
import jax
import jax.numpy as jnp
from jax.experimental import pallas as pl
from jax.experimental.pallas import tpu as pltpu

# ----------------------------- config ---------------------------------------
B, S, E, H = 2, 8, 32, 4           # batch, seq, embed_dim, num_heads
HD = E // H                         # head dim
FF = 4 * E                          # feed-forward hidden
EPS = 1e-5                          # LayerNorm eps (PyTorch default)
N = B * S                           # fused (batch*seq) rows = 16
G = H * N                           # block-diagonal score columns = 64
NEG = -1e9                          # additive mask for cross-batch score entries

# slab32 row offsets (everything with last dim E, sublane-stacked; slices at mult. of 8)
ROW_WQ, ROW_WK, ROW_WV, ROW_WO = 0, E, 2 * E, 3 * E
ROW_W2 = 4 * E                      # 128, FF rows
ROW_HM = ROW_W2 + FF                # 256, G rows (head feature mask)
ROW_VEC = ROW_HM + G                # 320, 9 rows: bq,bk,bv,bo,g1,be1,b2,g2,be2
SLAB32_ROWS = ROW_VEC + 9           # 329

# slab64 row offsets (last dim G)
ROW_NEG = 0                         # N rows (cross-batch additive mask)
ROW_BONES = N                       # G rows (per-(batch,head) block-ones)
SLAB64_ROWS = N + G                 # 80

# slab128 row offsets (last dim FF)
ROW_W1 = 0                          # E rows
ROW_B1 = E                          # 1 row
SLAB128_ROWS = E + 1                # 33


# ---------------- compile-time constants (hoisted out of the kernel) ---------
def _build_constants():
    # head_mask[r, f] = 1 iff feature f belongs to the head of kb-row r  (r = h*N + b*S + j)
    r_head = (np.arange(G) // N)[:, None]
    f_head = (np.arange(E) // HD)[None, :]
    head_mask = (r_head == f_head).astype(np.float32)                   # (G, E)

    # neg_mask[n, r] = 0 if kb-row r is in the same batch as token-row n, else -1e9
    n_batch = (np.arange(N) // S)[:, None]
    r_batch = ((np.arange(G) % N) // S)[None, :]
    neg_mask = np.where(n_batch == r_batch, 0.0, NEG).astype(np.float32)  # (N, G)

    # block_ones[r, r'] = 1 iff same (head, batch) block of size S
    rb = np.arange(G) // S
    block_ones = (rb[:, None] == rb[None, :]).astype(np.float32)        # (G, G)
    return head_mask, neg_mask, block_ones


HEAD_MASK_NP, NEG_MASK_NP, BLOCK_ONES_NP = _build_constants()


# ----------------------------- kernel ---------------------------------------
def transformer_block_kernel(x_ref, s32_ref, s64_ref, s128_ref, o_ref):
    x = x_ref[...]                                                       # (N, E) f32

    # ---- unpack slabs (sublane slices at multiples of 8 -> no relayout) ----
    wq = s32_ref[pl.ds(ROW_WQ, E), :]
    wk = s32_ref[pl.ds(ROW_WK, E), :]
    wv = s32_ref[pl.ds(ROW_WV, E), :]
    wo = s32_ref[pl.ds(ROW_WO, E), :]
    w2 = s32_ref[pl.ds(ROW_W2, FF), :]
    head_mask = s32_ref[pl.ds(ROW_HM, G), :]                            # (G, E)
    bq = s32_ref[ROW_VEC + 0, :]
    bk = s32_ref[ROW_VEC + 1, :]
    bv = s32_ref[ROW_VEC + 2, :]
    bo = s32_ref[ROW_VEC + 3, :]
    g1 = s32_ref[ROW_VEC + 4, :]
    be1 = s32_ref[ROW_VEC + 5, :]
    b2 = s32_ref[ROW_VEC + 6, :]
    g2 = s32_ref[ROW_VEC + 7, :]
    be2 = s32_ref[ROW_VEC + 8, :]

    neg_mask = s64_ref[pl.ds(ROW_NEG, N), :]                             # (N, G)
    block_ones = s64_ref[pl.ds(ROW_BONES, G), :]                         # (G, G)

    w1 = s128_ref[pl.ds(ROW_W1, E), :]                                   # (E, FF)
    b1 = s128_ref[ROW_B1, :]                                             # (FF,)

    # ---- q/k/v projections (weights pre-transposed, no in-kernel .T) ----
    q = jnp.dot(x, wq, preferred_element_type=jnp.float32) + bq          # (N, E)
    k = jnp.dot(x, wk, preferred_element_type=jnp.float32) + bk          # (N, E)
    v = jnp.dot(x, wv, preferred_element_type=jnp.float32) + bv          # (N, E)

    # ---- all (batch, head) pairs at once via block-diagonal masks ----
    # kb-row r = h*N + (b*S + j); feature mask zeroes everything outside head h.
    kb = jnp.concatenate([k] * H, axis=0) * head_mask                    # (G, E)
    vb = jnp.concatenate([v] * H, axis=0) * head_mask                    # (G, E)

    # scores[n, r] = <q_h[b,i], k_h[b',j]>; cross-batch entries pushed to -1e9.
    s = jax.lax.dot_general(q, kb, (((1,), (1,)), ((), ())),
                            preferred_element_type=jnp.float32)          # (N, G)
    s = s * (1.0 / math.sqrt(HD)) + neg_mask
    s = s - jnp.max(s, axis=-1, keepdims=True)                           # row max = valid max
    p = jnp.exp(s)                                                       # cross-batch -> exactly 0

    # per-(batch, head) block sums via one matmul against the block-ones matrix
    denom = jnp.dot(p, block_ones, preferred_element_type=jnp.float32)   # (N, G)
    p = p * pl.reciprocal(jnp.maximum(denom, 1e-30), approx=True)        # EUP reciprocal

    # attn re-assembles heads for free (vb is feature-masked per head)
    attn = jnp.dot(p, vb, preferred_element_type=jnp.float32)            # (N, E)
    attn = jnp.dot(attn, wo, preferred_element_type=jnp.float32) + bo    # out projection

    def layer_norm(t, g, b):
        mu = jnp.mean(t, axis=-1, keepdims=True)
        var = jnp.mean((t - mu) * (t - mu), axis=-1, keepdims=True)
        return (t - mu) * jax.lax.rsqrt(var + EPS) * g + b

    x1 = layer_norm(x + attn, g1, be1)                                   # (N, E)

    # ---- feed-forward (hidden dim FF = 128 = exactly lane width) ----
    h1 = jnp.dot(x1, w1, preferred_element_type=jnp.float32) + b1        # (N, FF)
    h1 = jnp.maximum(h1, 0.0)                                            # ReLU
    ff = jnp.dot(h1, w2, preferred_element_type=jnp.float32) + b2        # (N, E)

    o_ref[...] = layer_norm(x1 + ff, g2, be2).astype(o_ref.dtype)


# ----------------------------- wrapper ---------------------------------------
@jax.jit
def transformer_block(x, params):
    (in_w, in_b, out_w, out_b,
     ln1_g, ln1_b, ff_w1, ff_b1, ff_w2, ff_b2, ln2_g, ln2_b) = params

    # Pre-split & pre-transpose weights and pack everything into 3 sublane-stacked slabs.
    wq = in_w[:E, :].T
    wk = in_w[E:2 * E, :].T
    wv = in_w[2 * E:, :].T
    wo = out_w.T
    w2 = ff_w2.T                                                        # (FF, E)
    vecs = jnp.stack([in_b[:E], in_b[E:2 * E], in_b[2 * E:], out_b,
                      ln1_g, ln1_b, ff_b2, ln2_g, ln2_b], axis=0)       # (9, E)
    slab32 = jnp.concatenate(
        [wq, wk, wv, wo, w2, jnp.asarray(HEAD_MASK_NP), vecs], axis=0)  # (329, E)

    slab64 = jnp.concatenate(
        [jnp.asarray(NEG_MASK_NP), jnp.asarray(BLOCK_ONES_NP)], axis=0)  # (80, G)

    slab128 = jnp.concatenate([ff_w1.T, ff_b1.reshape(1, FF)], axis=0)   # (33, FF)

    xf = x.reshape(N, E)

    # advisory cost hint so XLA can schedule/overlap around this tiny custom call
    flops = (3 * 2 * N * E * E          # qkv projections
             + 2 * N * E * G            # scores
             + 2 * N * G * G            # block-ones denom
             + 2 * N * G * E            # attn
             + 2 * N * E * E            # out proj
             + 2 * 2 * N * E * FF)      # feed-forward
    bytes_accessed = 4 * (xf.size + slab32.size + slab64.size + slab128.size + N * E)
    cost = pl.CostEstimate(flops=int(flops),
                           transcendentals=int(2 * N * G + 4 * N),
                           bytes_accessed=int(bytes_accessed))

    out = pl.pallas_call(
        transformer_block_kernel,
        out_shape=jax.ShapeDtypeStruct((N, E), jnp.float32),
        in_specs=[pl.BlockSpec(memory_space=pltpu.MemorySpace.VMEM)] * 4,
        out_specs=pl.BlockSpec(memory_space=pltpu.MemorySpace.VMEM),
        cost_estimate=cost,
    )(xf, slab32, slab64, slab128)
    return out.reshape(B, S, E)


# ----------------------------- pure-JAX reference -----------------------------
def reference(x, params):
    (in_w, in_b, out_w, out_b,
     ln1_g, ln1_b, ff_w1, ff_b1, ff_w2, ff_b2, ln2_g, ln2_b) = params
    qkv = jnp.einsum("bse,fe->bsf", x, in_w) + in_b
    q, k, v = jnp.split(qkv, 3, axis=-1)

    def split_heads(t):
        return t.reshape(B, S, H, HD).transpose(0, 2, 1, 3)

    q, k, v = split_heads(q), split_heads(k), split_heads(v)
    s = jnp.einsum("bhqd,bhkd->bhqk", q, k) / math.sqrt(HD)
    p = jax.nn.softmax(s, axis=-1)
    o = jnp.einsum("bhqk,bhkd->bhqd", p, v).transpose(0, 2, 1, 3).reshape(B, S, E)
    attn = jnp.einsum("bse,fe->bsf", o, out_w) + out_b

    def ln(t, g, b):
        mu = jnp.mean(t, -1, keepdims=True)
        var = jnp.mean((t - mu) ** 2, -1, keepdims=True)
        return (t - mu) / jnp.sqrt(var + EPS) * g + b

    x1 = ln(x + attn, ln1_g, ln1_b)
    h1 = jax.nn.relu(jnp.einsum("bse,fe->bsf", x1, ff_w1) + ff_b1)
    ff = jnp.einsum("bsf,ef->bse", h1, ff_w2) + ff_b2
    return ln(x1 + ff, ln2_g, ln2_b)


# ----------------------------- main -------------------------------------------
if __name__ == "__main__":
    key = jax.random.PRNGKey(0)
    keys = jax.random.split(key, 16)

    def unif(k, shape, fan_in):
        bound = 1.0 / math.sqrt(fan_in)
        return jax.random.uniform(k, shape, jnp.float32, -bound, bound)

    x = jax.random.normal(keys[0], (B, S, E), jnp.float32)

    params = (
        unif(keys[1], (3 * E, E), E),        # in_proj_weight
        unif(keys[2], (3 * E,), E),          # in_proj_bias
        unif(keys[3], (E, E), E),            # out_proj.weight
        unif(keys[4], (E,), E),              # out_proj.bias
        jnp.ones((E,), jnp.float32),         # ln1 gamma
        jnp.zeros((E,), jnp.float32),        # ln1 beta
        unif(keys[5], (FF, E), E),           # ff linear1 weight
        unif(keys[6], (FF,), E),             # ff linear1 bias
        unif(keys[7], (E, FF), FF),          # ff linear2 weight
        unif(keys[8], (E,), FF),             # ff linear2 bias
        jnp.ones((E,), jnp.float32),         # ln2 gamma
        jnp.zeros((E,), jnp.float32),        # ln2 beta
    )

    out = jax.block_until_ready(transformer_block(x, params))
    ref = reference(x, params)
    assert out.shape == (B, S, E)
    # tolerance 1e-3: the EUP approximate reciprocal in the softmax adds ~1e-4 rel error
    assert jnp.allclose(out, ref, atol=1e-3, rtol=1e-3), "mismatch vs reference"

    print("KERNEL_OK")
</pallas_src>

<mosaic_0001>
module attributes {stable_mosaic.version = 11 : i64} {
  func.func @transformer_block_kernel(%arg0: memref<16x32xf32, #tpu.memory_space<vmem>>, %arg1: memref<329x32xf32, #tpu.memory_space<vmem>>, %arg2: memref<80x64xf32, #tpu.memory_space<vmem>>, %arg3: memref<33x128xf32, #tpu.memory_space<vmem>>, %arg4: memref<16x32xf32, #tpu.memory_space<vmem>>) attributes {dimension_semantics = [], scalar_prefetch = 0 : i64, scratch_operands = 0 : i64, tpu.core_type = #tpu.core_type<tc>} {
    %c0 = arith.constant 0 : index
    %c0_0 = arith.constant 0 : index
    %0 = vector.load %arg0[%c0, %c0_0] : memref<16x32xf32, #tpu.memory_space<vmem>>, vector<16x32xf32>
    %c0_1 = arith.constant 0 : index
    %c0_2 = arith.constant 0 : index
    %1 = vector.load %arg1[%c0_1, %c0_2] : memref<329x32xf32, #tpu.memory_space<vmem>>, vector<32x32xf32>
    %c32 = arith.constant 32 : index
    %c0_3 = arith.constant 0 : index
    %2 = vector.load %arg1[%c32, %c0_3] : memref<329x32xf32, #tpu.memory_space<vmem>>, vector<32x32xf32>
    %c64 = arith.constant 64 : index
    %c0_4 = arith.constant 0 : index
    %3 = vector.load %arg1[%c64, %c0_4] : memref<329x32xf32, #tpu.memory_space<vmem>>, vector<32x32xf32>
    %c96 = arith.constant 96 : index
    %c0_5 = arith.constant 0 : index
    %4 = vector.load %arg1[%c96, %c0_5] : memref<329x32xf32, #tpu.memory_space<vmem>>, vector<32x32xf32>
    %c128 = arith.constant 128 : index
    %c0_6 = arith.constant 0 : index
    %5 = vector.load %arg1[%c128, %c0_6] : memref<329x32xf32, #tpu.memory_space<vmem>>, vector<128x32xf32>
    %c256 = arith.constant 256 : index
    %c0_7 = arith.constant 0 : index
    %6 = vector.load %arg1[%c256, %c0_7] : memref<329x32xf32, #tpu.memory_space<vmem>>, vector<64x32xf32>
    %c320 = arith.constant 320 : index
    %c0_8 = arith.constant 0 : index
    %7 = vector.load %arg1[%c320, %c0_8] : memref<329x32xf32, #tpu.memory_space<vmem>>, vector<1x32xf32>
    %8 = vector.shape_cast %7 : vector<1x32xf32> to vector<32xf32>
    %c321 = arith.constant 321 : index
    %c0_9 = arith.constant 0 : index
    %9 = vector.load %arg1[%c321, %c0_9] : memref<329x32xf32, #tpu.memory_space<vmem>>, vector<1x32xf32>
    %10 = vector.shape_cast %9 : vector<1x32xf32> to vector<32xf32>
    %c322 = arith.constant 322 : index
    %c0_10 = arith.constant 0 : index
    %11 = vector.load %arg1[%c322, %c0_10] : memref<329x32xf32, #tpu.memory_space<vmem>>, vector<1x32xf32>
    %12 = vector.shape_cast %11 : vector<1x32xf32> to vector<32xf32>
    %c323 = arith.constant 323 : index
    %c0_11 = arith.constant 0 : index
    %13 = vector.load %arg1[%c323, %c0_11] : memref<329x32xf32, #tpu.memory_space<vmem>>, vector<1x32xf32>
    %14 = vector.shape_cast %13 : vector<1x32xf32> to vector<32xf32>
    %c324 = arith.constant 324 : index
    %c0_12 = arith.constant 0 : index
    %15 = vector.load %arg1[%c324, %c0_12] : memref<329x32xf32, #tpu.memory_space<vmem>>, vector<1x32xf32>
    %16 = vector.shape_cast %15 : vector<1x32xf32> to vector<32xf32>
    %c325 = arith.constant 325 : index
    %c0_13 = arith.constant 0 : index
    %17 = vector.load %arg1[%c325, %c0_13] : memref<329x32xf32, #tpu.memory_space<vmem>>, vector<1x32xf32>
    %18 = vector.shape_cast %17 : vector<1x32xf32> to vector<32xf32>
    %c326 = arith.constant 326 : index
    %c0_14 = arith.constant 0 : index
    %19 = vector.load %arg1[%c326, %c0_14] : memref<329x32xf32, #tpu.memory_space<vmem>>, vector<1x32xf32>
    %20 = vector.shape_cast %19 : vector<1x32xf32> to vector<32xf32>
    %c327 = arith.constant 327 : index
    %c0_15 = arith.constant 0 : index
    %21 = vector.load %arg1[%c327, %c0_15] : memref<329x32xf32, #tpu.memory_space<vmem>>, vector<1x32xf32>
    %22 = vector.shape_cast %21 : vector<1x32xf32> to vector<32xf32>
    %c328 = arith.constant 328 : index
    %c0_16 = arith.constant 0 : index
    %23 = vector.load %arg1[%c328, %c0_16] : memref<329x32xf32, #tpu.memory_space<vmem>>, vector<1x32xf32>
    %24 = vector.shape_cast %23 : vector<1x32xf32> to vector<32xf32>
    %c0_17 = arith.constant 0 : index
    %c0_18 = arith.constant 0 : index
    %25 = vector.load %arg2[%c0_17, %c0_18] : memref<80x64xf32, #tpu.memory_space<vmem>>, vector<16x64xf32>
    %c16 = arith.constant 16 : index
    %c0_19 = arith.constant 0 : index
    %26 = vector.load %arg2[%c16, %c0_19] : memref<80x64xf32, #tpu.memory_space<vmem>>, vector<64x64xf32>
    %c0_20 = arith.constant 0 : index
    %c0_21 = arith.constant 0 : index
    %27 = vector.load %arg3[%c0_20, %c0_21] : memref<33x128xf32, #tpu.memory_space<vmem>>, vector<32x128xf32>
    %c32_22 = arith.constant 32 : index
    %c0_23 = arith.constant 0 : index
    %28 = vector.load %arg3[%c32_22, %c0_23] : memref<33x128xf32, #tpu.memory_space<vmem>>, vector<1x128xf32>
    %29 = vector.shape_cast %28 : vector<1x128xf32> to vector<128xf32>
    %cst = arith.constant dense<0.000000e+00> : vector<16x32xf32>
    %30 = tpu.matmul %0, %1, %cst {dimension_numbers = #tpu.dot_dimension_numbers<[1], [0], [0], [1], [0, 0, 1, 1], [], []>} : vector<16x32xf32>, vector<32x32xf32>, vector<16x32xf32> -> vector<16x32xf32>
    %31 = vector.shape_cast %8 : vector<32xf32> to vector<1x32xf32>
    %32 = vector.broadcast %31 : vector<1x32xf32> to vector<16x32xf32>
    %33 = arith.addf %30, %32 : vector<16x32xf32>
    %cst_24 = arith.constant dense<0.000000e+00> : vector<16x32xf32>
    %34 = tpu.matmul %0, %2, %cst_24 {dimension_numbers = #tpu.dot_dimension_numbers<[1], [0], [0], [1], [0, 0, 1, 1], [], []>} : vector<16x32xf32>, vector<32x32xf32>, vector<16x32xf32> -> vector<16x32xf32>
    %35 = vector.shape_cast %10 : vector<32xf32> to vector<1x32xf32>
    %36 = vector.broadcast %35 : vector<1x32xf32> to vector<16x32xf32>
    %37 = arith.addf %34, %36 : vector<16x32xf32>
    %cst_25 = arith.constant dense<0.000000e+00> : vector<16x32xf32>
    %38 = tpu.matmul %0, %3, %cst_25 {dimension_numbers = #tpu.dot_dimension_numbers<[1], [0], [0], [1], [0, 0, 1, 1], [], []>} : vector<16x32xf32>, vector<32x32xf32>, vector<16x32xf32> -> vector<16x32xf32>
    %39 = vector.shape_cast %12 : vector<32xf32> to vector<1x32xf32>
    %40 = vector.broadcast %39 : vector<1x32xf32> to vector<16x32xf32>
    %41 = arith.addf %38, %40 : vector<16x32xf32>
    %42 = tpu.concatenate %37, %37, %37, %37 in 0 : vector<16x32xf32>, vector<16x32xf32>, vector<16x32xf32>, vector<16x32xf32> -> vector<64x32xf32>
    %43 = arith.mulf %42, %6 : vector<64x32xf32>
    %44 = tpu.concatenate %41, %41, %41, %41 in 0 : vector<16x32xf32>, vector<16x32xf32>, vector<16x32xf32>, vector<16x32xf32> -> vector<64x32xf32>
    %45 = arith.mulf %44, %6 : vector<64x32xf32>
    %cst_26 = arith.constant dense<0.000000e+00> : vector<16x64xf32>
    %46 = tpu.matmul %33, %43, %cst_26 {dimension_numbers = #tpu.dot_dimension_numbers<[1], [1], [0], [0], [0, 0, 1, 0], [], []>} : vector<16x32xf32>, vector<64x32xf32>, vector<16x64xf32> -> vector<16x64xf32>
    %cst_27 = arith.constant 0.353553385 : f32
    %47 = vector.broadcast %cst_27 : f32 to vector<16x64xf32>
    %48 = arith.mulf %46, %47 : vector<16x64xf32>
    %49 = arith.addf %48, %25 : vector<16x64xf32>
    %cst_28 = arith.constant dense<0xFF800000> : vector<16xf32>
    %50 = vector.multi_reduction <maximumf>, %49, %cst_28 [1] : vector<16x64xf32> to vector<16xf32>
    %51 = vector.shape_cast %50 : vector<16xf32> to vector<16x1xf32>
    %52 = vector.broadcast %51 : vector<16x1xf32> to vector<16x64xf32>
    %53 = arith.subf %49, %52 : vector<16x64xf32>
    %54 = math.exp %53 : vector<16x64xf32>
    %cst_29 = arith.constant dense<0.000000e+00> : vector<16x64xf32>
    %55 = tpu.matmul %54, %26, %cst_29 {dimension_numbers = #tpu.dot_dimension_numbers<[1], [0], [0], [1], [0, 0, 1, 1], [], []>} : vector<16x64xf32>, vector<64x64xf32>, vector<16x64xf32> -> vector<16x64xf32>
    %cst_30 = arith.constant 1.000000e-30 : f32
    %56 = vector.broadcast %cst_30 : f32 to vector<16x64xf32>
    %57 = arith.maximumf %55, %56 : vector<16x64xf32>
    %58 = tpu.reciprocal %57 {approx = true} : vector<16x64xf32> -> vector<16x64xf32>
    %59 = arith.mulf %54, %58 : vector<16x64xf32>
    %cst_31 = arith.constant dense<0.000000e+00> : vector<16x32xf32>
    %60 = tpu.matmul %59, %45, %cst_31 {dimension_numbers = #tpu.dot_dimension_numbers<[1], [0], [0], [1], [0, 0, 1, 1], [], []>} : vector<16x64xf32>, vector<64x32xf32>, vector<16x32xf32> -> vector<16x32xf32>
    %cst_32 = arith.constant dense<0.000000e+00> : vector<16x32xf32>
    %61 = tpu.matmul %60, %4, %cst_32 {dimension_numbers = #tpu.dot_dimension_numbers<[1], [0], [0], [1], [0, 0, 1, 1], [], []>} : vector<16x32xf32>, vector<32x32xf32>, vector<16x32xf32> -> vector<16x32xf32>
    %62 = vector.shape_cast %14 : vector<32xf32> to vector<1x32xf32>
    %63 = vector.broadcast %62 : vector<1x32xf32> to vector<16x32xf32>
    %64 = arith.addf %61, %63 : vector<16x32xf32>
    %65 = arith.addf %0, %64 : vector<16x32xf32>
    %cst_33 = arith.constant dense<0.000000e+00> : vector<16xf32>
    %66 = vector.multi_reduction <add>, %65, %cst_33 [1] : vector<16x32xf32> to vector<16xf32>
    %67 = vector.shape_cast %66 : vector<16xf32> to vector<16x1xf32>
    %cst_34 = arith.constant 3.200000e+01 : f32
    %68 = vector.broadcast %cst_34 : f32 to vector<16x1xf32>
    %69 = arith.divf %67, %68 : vector<16x1xf32>
    %70 = vector.broadcast %69 : vector<16x1xf32> to vector<16x32xf32>
    %71 = arith.subf %65, %70 : vector<16x32xf32>
    %72 = vector.broadcast %69 : vector<16x1xf32> to vector<16x32xf32>
    %73 = arith.subf %65, %72 : vector<16x32xf32>
    %74 = arith.mulf %71, %73 : vector<16x32xf32>
    %cst_35 = arith.constant dense<0.000000e+00> : vector<16xf32>
    %75 = vector.multi_reduction <add>, %74, %cst_35 [1] : vector<16x32xf32> to vector<16xf32>
    %76 = vector.shape_cast %75 : vector<16xf32> to vector<16x1xf32>
    %cst_36 = arith.constant 3.200000e+01 : f32
    %77 = vector.broadcast %cst_36 : f32 to vector<16x1xf32>
    %78 = arith.divf %76, %77 : vector<16x1xf32>
    %79 = vector.broadcast %69 : vector<16x1xf32> to vector<16x32xf32>
    %80 = arith.subf %65, %79 : vector<16x32xf32>
    %cst_37 = arith.constant 9.99999974E-6 : f32
    %81 = vector.broadcast %cst_37 : f32 to vector<16x1xf32>
    %82 = arith.addf %78, %81 : vector<16x1xf32>
    %83 = math.rsqrt %82 : vector<16x1xf32>
    %84 = vector.broadcast %83 : vector<16x1xf32> to vector<16x32xf32>
    %85 = arith.mulf %80, %84 : vector<16x32xf32>
    %86 = vector.shape_cast %16 : vector<32xf32> to vector<1x32xf32>
    %87 = vector.broadcast %86 : vector<1x32xf32> to vector<16x32xf32>
    %88 = arith.mulf %85, %87 : vector<16x32xf32>
    %89 = vector.shape_cast %18 : vector<32xf32> to vector<1x32xf32>
    %90 = vector.broadcast %89 : vector<1x32xf32> to vector<16x32xf32>
    %91 = arith.addf %88, %90 : vector<16x32xf32>
    %cst_38 = arith.constant dense<0.000000e+00> : vector<16x128xf32>
    %92 = tpu.matmul %91, %27, %cst_38 {dimension_numbers = #tpu.dot_dimension_numbers<[1], [0], [0], [1], [0, 0, 1, 1], [], []>} : vector<16x32xf32>, vector<32x128xf32>, vector<16x128xf32> -> vector<16x128xf32>
    %93 = vector.shape_cast %29 : vector<128xf32> to vector<1x128xf32>
    %94 = vector.broadcast %93 : vector<1x128xf32> to vector<16x128xf32>
    %95 = arith.addf %92, %94 : vector<16x128xf32>
    %cst_39 = arith.constant 0.000000e+00 : f32
    %96 = vector.broadcast %cst_39 : f32 to vector<16x128xf32>
    %97 = arith.maximumf %95, %96 : vector<16x128xf32>
    %cst_40 = arith.constant dense<0.000000e+00> : vector<16x32xf32>
    %98 = tpu.matmul %97, %5, %cst_40 {dimension_numbers = #tpu.dot_dimension_numbers<[1], [0], [0], [1], [0, 0, 1, 1], [], []>} : vector<16x128xf32>, vector<128x32xf32>, vector<16x32xf32> -> vector<16x32xf32>
    %99 = vector.shape_cast %20 : vector<32xf32> to vector<1x32xf32>
    %100 = vector.broadcast %99 : vector<1x32xf32> to vector<16x32xf32>
    %101 = arith.addf %98, %100 : vector<16x32xf32>
    %102 = arith.addf %91, %101 : vector<16x32xf32>
    %cst_41 = arith.constant dense<0.000000e+00> : vector<16xf32>
    %103 = vector.multi_reduction <add>, %102, %cst_41 [1] : vector<16x32xf32> to vector<16xf32>
    %104 = vector.shape_cast %103 : vector<16xf32> to vector<16x1xf32>
    %cst_42 = arith.constant 3.200000e+01 : f32
    %105 = vector.broadcast %cst_42 : f32 to vector<16x1xf32>
    %106 = arith.divf %104, %105 : vector<16x1xf32>
    %107 = vector.broadcast %106 : vector<16x1xf32> to vector<16x32xf32>
    %108 = arith.subf %102, %107 : vector<16x32xf32>
    %109 = vector.broadcast %106 : vector<16x1xf32> to vector<16x32xf32>
    %110 = arith.subf %102, %109 : vector<16x32xf32>
    %111 = arith.mulf %108, %110 : vector<16x32xf32>
    %cst_43 = arith.constant dense<0.000000e+00> : vector<16xf32>
    %112 = vector.multi_reduction <add>, %111, %cst_43 [1] : vector<16x32xf32> to vector<16xf32>
    %113 = vector.shape_cast %112 : vector<16xf32> to vector<16x1xf32>
    %cst_44 = arith.constant 3.200000e+01 : f32
    %114 = vector.broadcast %cst_44 : f32 to vector<16x1xf32>
    %115 = arith.divf %113, %114 : vector<16x1xf32>
    %116 = vector.broadcast %106 : vector<16x1xf32> to vector<16x32xf32>
    %117 = arith.subf %102, %116 : vector<16x32xf32>
    %cst_45 = arith.constant 9.99999974E-6 : f32
    %118 = vector.broadcast %cst_45 : f32 to vector<16x1xf32>
    %119 = arith.addf %115, %118 : vector<16x1xf32>
    %120 = math.rsqrt %119 : vector<16x1xf32>
    %121 = vector.broadcast %120 : vector<16x1xf32> to vector<16x32xf32>
    %122 = arith.mulf %117, %121 : vector<16x32xf32>
    %123 = vector.shape_cast %22 : vector<32xf32> to vector<1x32xf32>
    %124 = vector.broadcast %123 : vector<1x32xf32> to vector<16x32xf32>
    %125 = arith.mulf %122, %124 : vector<16x32xf32>
    %126 = vector.shape_cast %24 : vector<32xf32> to vector<1x32xf32>
    %127 = vector.broadcast %126 : vector<1x32xf32> to vector<16x32xf32>
    %128 = arith.addf %125, %127 : vector<16x32xf32>
    %c0_46 = arith.constant 0 : index
    %c0_47 = arith.constant 0 : index
    %129 = vector.load %arg4[%c0_46, %c0_47] : memref<16x32xf32, #tpu.memory_space<vmem>>, vector<16x32xf32>
    tpu.vector_store %arg4[%c0_46, %c0_47], %128 {strides = array<i32>} : memref<16x32xf32, #tpu.memory_space<vmem>>, vector<16x32xf32>,
    return
  }
}

</mosaic_0001>

<bundles_post_ra>
// kernel: transformer_block.1
= control target key start
LH: loop header
LB: loop body
LE: loop exit
PB: predicated region body
PF: predicated region fallthrough
CT: control target
= control target key end

     0   :  { %vm88_vm0 = vcmask 261120   ;;  %s1736_s0 = inlined_call_operand.vmem [shape: f32[16,32], index: 0, kind: input, shape index: {}]   ;;  %s1737_s1 = inlined_call_operand.vmem [shape: f32[329,32], index: 1, kind: input, shape index: {}]   ;;  %s1738_s2 = inlined_call_operand.vmem [shape: f32[80,64], index: 2, kind: input, shape index: {}]   ;;  %s1739_s3 = inlined_call_operand.vmem [shape: f32[33,128], index: 3, kind: input, shape index: {}]   ;;  %s1740_s4 = inlined_call_operand.hbm [shape: f32[16,32], index: 4, kind: output, shape index: {}]  }
   0x1   :  { %v20_v0 = vld [vmem:[%s1737_s1] sm:$0xff]  ;;  %v21_v1 = vld [vmem:[%s1737_s1 + $0x8] sm:$0xff]  ;;  %v22_v2 = vld [vmem:[%s1737_s1 + $0x10] sm:$0xff] }
   0x2   :  { %v1243_v3 = vpack.c.bf16 %v21_v1, %v20_v0  ;;  %v23_v4 = vld [vmem:[%s1737_s1 + $0x18] sm:$0xff]  ;;  %v1457_v5 = vld [vmem:[%s1736_s0] sm:$0xff]  ;;  %v25_v8 = vld [vmem:[%s1737_s1 + $0x28] sm:$0xff] }
   0x3   :  { %v1247_v6 = vpack.c.bf16 %v23_v4, %v22_v2  ;;  %1104 = vmatprep.mubr.msk.f32.mxu0 %vm88_vm0, %v1457_v5  ;;  %v24_v7 = vld [vmem:[%s1737_s1 + $0x20] sm:$0xff] }
   0x4   :  { %1244 = vmatprep.subr.bf16.mxu0 %v1243_v3 }
   0x5   :  { %9 = vsyncpa [#allocation3], 0  ;;  %1246 = vmatpush3.bf16.msra.mxu0 %v1243_v3  ;;  %v1251_v9 = vpack.c.bf16 %v25_v8, %v24_v7  ;;  %v26_v10 = vld [vmem:[%s1737_s1 + $0x30] sm:$0xff]  ;;  %v27_v11 = vld [vmem:[%s1737_s1 + $0x38] sm:$0xff]  ;;  %vm453_vm2 = vcmask 523264   ;;  %s1414_s9 = smov [#allocation2]  }
   0x6   :  { %1248 = vmatprep.subr.bf16.mxu0 %v1247_v6  ;;  %v1476_v12 = vld [vmem:[%s1736_s0 + $0x8] sm:$0xff]  ;;  %v1255_v13 = vpack.c.bf16 %v27_v11, %v26_v10  ;;  %v984_v14 = vld [vmem:[%s1737_s1 + $0x140] ss:$0 sm:$0xff]  ;;  %v987_v18 = vld [vmem:[%s1737_s1 + $0x141] ss:$0 sm:$0xff]  ;;  %s973_s0 = sshll.u32 %s1414_s9, 4  ;;  %s974_s0 = int_to_ptr.vmem [resolvable:$true] %s973_s0 }
   0x7   :  { %v1496_v19 = vld [vmem:[%s1737_s1 + $0x118] sm:$0xff]  ;;  %v1501_v20 = vld [vmem:[%s1737_s1 + $0x128] sm:$0xff]  ;;  %v1511_v23 = vld [vmem:[%s1737_s1 + $0x110] sm:$0xff]  ;;  %s1390_s10 = scalar_lea.vmem %s974_s0, 256  ;;  %p1395_p1 = scmp.lt.s32.totalorder %s974_s0, %s974_s0 }
   0x8   :  { %v1506_v21 = vld [vmem:[%s1737_s1 + $0x138] sm:$0xff]  ;;  %v1516_v24 = vld [vmem:[%s1737_s1 + $0x108] sm:$0xff]  ;;  %v1521_v26 = vld [vmem:[%s1737_s1 + $0x120] sm:$0xff]  ;;  %p1391_p0 = scmp.ne.s32.totalorder %s974_s0, %s1390_s10  ;;  %p1396_p2 = scmp.lt.s32.totalorder %s1390_s10, %s1390_s10 }
   0x9   :  { %1250 = vmatpush3.bf16.msra.mxu0 %v1247_v6  ;;  %v1526_v27 = vld [vmem:[%s1737_s1 + $0x130] sm:$0xff]  ;;  %v1531_v29 = vld [vmem:[%s1737_s1 + $0x100] sm:$0xff]  ;;  %vm1268_vm1 = vmpackc.low %vm88_vm0, %vm88_vm0 }
   0xa   :  { %1252 = vmatprep.subr.bf16.mxu0 %v1251_v9  ;;  %v28_v44 = vld [vmem:[%s1737_s1 + $0x40] sm:$0xff]  ;;  %v29_v45 = vld [vmem:[%s1737_s1 + $0x48] sm:$0xff]  ;;  %v30_v46 = vld [vmem:[%s1737_s1 + $0x50] sm:$0xff]  ;;  %p1397_p3 = por %p1396_p2, %p1395_p1 }
   0xb   :  { %v1259_v47 = vpack.c.bf16 %v29_v45, %v28_v44  ;;  %v31_v48 = vld [vmem:[%s1737_s1 + $0x58] sm:$0xff]  ;;  %v69_v52 = vld [vmem:[%s1738_s2] sm:$0xff]  ;;  %v70_v55 = vld [vmem:[%s1738_s2 + $0x8] sm:$0xff] }
   0xc   :  { %1105 = vmatmul.mubr.msk.f32.vlgmr.msra.gmra.mrb[0].mxu0 %vm88_vm0, %v1476_v12  ;;  %v1263_v49 = vpack.c.bf16 %v31_v48, %v30_v46  ;;  %v71_v60 = vld [vmem:[%s1738_s2 + $0x10] sm:$0xff]  ;;  %v72_v61 = vld [vmem:[%s1738_s2 + $0x18] sm:$0xff]  ;;  %v73_v63 = vld [vmem:[%s1738_s2 + $0x20] sm:$0xff]  ;;  %p1398_p4 = pnand %p1397_p3, %p1391_p0 }
   0xd   :  { %1254 = vmatpush3.bf16.msra.mxu0 %v1251_v9  ;;  %1115 = vmatprep.mubr.msk.f32.mxu0 %vm88_vm0, %v1457_v5  ;;  %v1291_v62 = vpack.c.bf16 %v72_v61, %v71_v60  ;;  %v74_v0 = vld [vmem:[%s1738_s2 + $0x28] sm:$0xff]  ;;  %v75_v2 = vld [vmem:[%s1738_s2 + $0x30] sm:$0xff]  ;;  %v76_v3 = vld [vmem:[%s1738_s2 + $0x38] sm:$0xff] }
   0xe   :  { %1256 = vmatprep.subr.bf16.mxu0 %v1255_v13  ;;  %v1295_v1 = vpack.c.bf16 %v74_v0, %v73_v63  ;;  %v77_v4 = vld [vmem:[%s1738_s2 + $0x40] sm:$0xff]  ;;  %v1299_v6 = vpack.c.bf16 %v76_v3, %v75_v2  ;;  %v78_v7 = vld [vmem:[%s1738_s2 + $0x48] sm:$0xff] }
   0xf   :  { %v1303_v8 = vpack.c.bf16 %v78_v7, %v77_v4  ;;  %v990_v9 = vld [vmem:[%s1737_s1 + $0x142] ss:$0 sm:$0xff] }
  0x10   :  { %v79_v4 = vld [vmem:[%s1739_s3] sm:$0xff] }
  0x11   :  { %1258 = vmatpush3.bf16.msra.mxu0 %v1255_v13 }
  0x12   :  { %1260 = vmatprep.subr.bf16.mxu0 %v1259_v47 }
  0x14   :  { %1116 = vmatmul.mubr.msk.f32.vlgmr.msra.gmra.mrb[2].mxu0 %vm88_vm0, %v1476_v12 }
  0x15   :  { %1126 = vmatprep.mubr.msk.f32.mxu0 %vm88_vm0, %v1457_v5  ;;  %1262 = vmatpush3.bf16.msra.mxu0 %v1259_v47 }
  0x16   :  { %1264 = vmatprep.subr.bf16.mxu0 %v1263_v49 }
  0x19   :  { %1266 = vmatpush3.bf16.msra.mxu0 %v1263_v49 }
  0x1a   :  { %1292 = vmatprep.subr.bf16.mxu0 %v1291_v62 }
  0x1c   :  { %1127 = vmatmul.mubr.msk.f32.vlgmr.msra.gmra.mrb[4].mxu0 %vm88_vm0, %v1476_v12 }
  0x1d   :  { %1294 = vmatpush3.bf16.msra.mxu0 %v1291_v62 }
  0x1e   :  { %1296 = vmatprep.subr.bf16.mxu0 %v1295_v1 }
  0x21   :  { %1298 = vmatpush3.bf16.msra.mxu0 %v1295_v1 }
  0x22   :  { %1300 = vmatprep.subr.bf16.mxu0 %v1299_v6 }
  0x25   :  { %1302 = vmatpush3.bf16.msra.mxu0 %v1299_v6  ;;  %v80_v6 = vld [vmem:[%s1739_s3 + $0x8] sm:$0xff] }
  0x26   :  { %1304 = vmatprep.subr.bf16.mxu0 %v1303_v8  ;;  %v1331_v7 = vpack.c.bf16 %v80_v6, %v79_v4 }
  0x29   :  { %1306 = vmatpush3.bf16.msra.mxu0 %v1303_v8  ;;  %v81_v8 = vld [vmem:[%s1739_s3 + $0x10] sm:$0xff] }
  0xdf   :  { %v1106_v15 = vpop.f32.mrb[0].mxu0 }
  0xe0   :  { %v161_v16 = vpop.f32.mrb[1].mxu0  ;;  %v167_v43 = vadd.f32 %v1106_v15, %v984_v14 }
  0xe1   :  { %v162_v17 = vadd.f32 %v984_v14, %v161_v16 }
  0xe3   :  { %1145 = vmatprep.mubr.msk.f32.mxu1 %vm88_vm0, %v162_v17 }
  0xe7   :  { %v1117_v22 = vpop.f32.mrb[2].mxu0 }
  0xe8   :  { %v246_v25 = vadd.f32 %v1117_v22, %v987_v18  ;;  %v240_v28 = vpop.f32.mrb[3].mxu0 }
  0xe9   :  { %v241_v30 = vadd.f32 %v987_v18, %v240_v28 }
  0xea   :  { %v331_v31 = vmul.f32 %v246_v25, %v1496_v19  ;;  %v333_v32 = vmul.f32 %v246_v25, %v1501_v20  ;;  %v335_v33 = vmul.f32 %v246_v25, %v1506_v21  ;;  %v329_v34 = vmul.f32 %v246_v25, %v1516_v24 }
  0xeb   :  { %v330_v35 = vmul.f32 %v241_v30, %v1511_v23  ;;  %v332_v36 = vmul.f32 %v241_v30, %v1521_v26  ;;  %v334_v37 = vmul.f32 %v241_v30, %v1526_v27  ;;  %v328_v38 = vmul.f32 %v241_v30, %v1531_v29 }
  0xed   :  { %v1267_v39 = vpack.c.bf16 %v329_v34, %v328_v38  ;;  %v1273_v40 = vpack.c.bf16 %v331_v31, %v330_v35  ;;  %v1279_v41 = vpack.c.bf16 %v333_v32, %v332_v36  ;;  %v1285_v42 = vpack.c.bf16 %v335_v33, %v334_v37  ;;  %v34_v37 = vld [vmem:[%s1737_s1 + $0x70] sm:$0xff] }
  0xef   :  { %1269 = vmatprep.subr.msk.bf16.mxu1 %vm1268_vm1, %v1267_v39  ;;  %v1128_v10 = vpop.f32.mrb[4].mxu0 }
  0xf0   :  { %1272 = vmatpush3.bf16.xpose.msk.msra.mxu1 %vm1268_vm1, %v1267_v39  ;;  %v325_v11 = vadd.f32 %v1128_v10, %v990_v9  ;;  %v319_v13 = vpop.f32.mrb[5].mxu0  ;;  %v35_v39 = vld [vmem:[%s1737_s1 + $0x78] sm:$0xff] }
  0xf1   :  { %1275 = vmatprep.subr.msk.bf16.mxu1 %vm1268_vm1, %v1273_v40  ;;  %v320_v14 = vadd.f32 %v990_v9, %v319_v13  ;;  %v82_v9 = vld [vmem:[%s1739_s3 + $0x18] sm:$0xff]  ;;  %v37_v13 = vld [vmem:[%s1737_s1 + $0x88] sm:$0xff] }
  0xf2   :  { %v337_v15 = vmul.f32 %v325_v11, %v1516_v24  ;;  %v339_v16 = vmul.f32 %v325_v11, %v1496_v19  ;;  %v341_v17 = vmul.f32 %v325_v11, %v1501_v20  ;;  %v343_v18 = vmul.f32 %v325_v11, %v1506_v21  ;;  %v36_v11 = vld [vmem:[%s1737_s1 + $0x80] sm:$0xff] }
  0xf3   :  { %v336_v22 = vmul.f32 %v320_v14, %v1531_v29  ;;  %v338_v25 = vmul.f32 %v320_v14, %v1511_v23  ;;  %v340_v28 = vmul.f32 %v320_v14, %v1521_v26  ;;  %v342_v30 = vmul.f32 %v320_v14, %v1526_v27  ;;  %v32_v26 = vld [vmem:[%s1737_s1 + $0x60] sm:$0xff]  ;;  %v33_v27 = vld [vmem:[%s1737_s1 + $0x68] sm:$0xff]  ;;  %v38_v14 = vld [vmem:[%s1737_s1 + $0x90] sm:$0xff] }
  0xf4   :  { %v1323_v38 = vpack.c.bf16 %v33_v27, %v32_v26  ;;  %v1335_v10 = vpack.c.bf16 %v82_v9, %v81_v8 }
  0xf5   :  { %v1307_v31 = vpack.c.bf16 %v337_v15, %v336_v22  ;;  %v1311_v32 = vpack.c.bf16 %v339_v16, %v338_v25  ;;  %v1315_v33 = vpack.c.bf16 %v341_v17, %v340_v28  ;;  %v1319_v34 = vpack.c.bf16 %v343_v18, %v342_v30  ;;  %v39_v16 = vld [vmem:[%s1737_s1 + $0x98] sm:$0xff]  ;;  %v40_v18 = vld [vmem:[%s1737_s1 + $0xa0] sm:$0xff]  ;;  %v41_v22 = vld [vmem:[%s1737_s1 + $0xa8] sm:$0xff] }
  0xf6   :  { %v1339_v15 = vpack.c.bf16 %v37_v13, %v36_v11  ;;  %v1343_v17 = vpack.c.bf16 %v39_v16, %v38_v14  ;;  %v1347_v25 = vpack.c.bf16 %v41_v22, %v40_v18  ;;  %v42_v28 = vld [vmem:[%s1737_s1 + $0xb0] sm:$0xff]  ;;  %v43_v30 = vld [vmem:[%s1737_s1 + $0xb8] sm:$0xff] }
  0xf7   :  { %1308 = vmatprep.subr.bf16.mxu0 %v1307_v31 }
  0xf8   :  { %1278 = vmatpush3.bf16.xpose.msk.msra.mxu1 %vm1268_vm1, %v1273_v40  ;;  %v1327_v40 = vpack.c.bf16 %v35_v39, %v34_v37 }
  0xf9   :  { %1281 = vmatprep.subr.msk.bf16.mxu1 %vm1268_vm1, %v1279_v41 }
 0x100   :  { %1284 = vmatpush3.bf16.xpose.msk.msra.mxu1 %vm1268_vm1, %v1279_v41 }
 0x101   :  { %1287 = vmatprep.subr.msk.bf16.mxu1 %vm1268_vm1, %v1285_v42 }
 0x108   :  { %1290 = vmatpush3.bf16.xpose.msk.msra.mxu1 %vm1268_vm1, %v1285_v42 }
 0x109   :  { %1324 = vmatprep.subr.bf16.mxu1 %v1323_v38 }
 0x10f   :  { %1146 = vmatmul.mubr.msk.f32.vlgmr.msra.gmra.mrb[0].mxu1 %vm88_vm0, %v167_v43 }
 0x110   :  { %1326 = vmatpush3.bf16.msra.mxu1 %v1323_v38 }
 0x111   :  { %1328 = vmatprep.subr.bf16.mxu1 %v1327_v40 }
 0x114   :  { %1330 = vmatpush3.bf16.msra.mxu1 %v1327_v40  ;;  %v1010_v40 = vld [vmem:[%s1737_s1 + $0x144] ss:$0 sm:$0xff] }
 0x115   :  { %1340 = vmatprep.subr.bf16.mxu1 %v1339_v15 }
 0x1e2   :  { %v1147_v50 = vpop.f32.mrb[0].mxu1 }
 0x1e3   :  { %v440_v51 = vpop.f32.mrb[1].mxu1  ;;  %v450_v53 = vmul.f32 0.35355338, %v1147_v50 }
 0x1e4   :  { %v449_v54 = vmul.f32 0.35355338, %v440_v51  ;;  %v1007_v51 = vld [vmem:[%s1737_s1 + $0x143] ss:$0 sm:$0xff] }
 0x1e5   :  { %v452_v58 = vadd.f32 %v450_v53, %v70_v55 }
 0x1e6   :  { %v451_v56 = vadd.f32 %v449_v54, %v69_v52 }
 0x1e7   :  { %v457_v59 = vsel %vm453_vm2, %v452_v58, -inf }
 0x1e8   :  { %v454_v57 = vsel %vm453_vm2, %v451_v56, -inf }
 0x1e9   :  { %455 = vmax.xlane.f32.xlu0 %v454_v57 }
 0x1ed   :  { %458 = vmax.xlane.f32.xlu0 %v457_v59 }
 0x276   :  { %v456_v24 = vpop.xlane.xlu0 %455 }
 0x277   :  { %v460_v35 = vsub.f32 %v451_v56, %v456_v24  ;;  %v46_v24 = vld [vmem:[%s1737_s1 + $0xd0] sm:$0xff] }
 0x279   :  { %v462_v19 = vmul.f32 1.442695, %v460_v35  ;;  %v47_v35 = vld [vmem:[%s1737_s1 + $0xd8] sm:$0xff] }
 0x27a   :  { %v459_v36 = vpop.xlane.xlu0 %458 }
 0x27b   :  { %1374 = vpow2.f32 %v462_v19  ;;  %v461_v20 = vsub.f32 %v452_v58, %v459_v36  ;;  %v1359_v19 = vpack.c.bf16 %v47_v35, %v46_v24  ;;  %v48_v36 = vld [vmem:[%s1737_s1 + $0xe0] sm:$0xff] }
 0x27d   :  { %v464_v21 = vmul.f32 1.442695, %v461_v20  ;;  %v49_v20 = vld [vmem:[%s1737_s1 + $0xe8] sm:$0xff] }
 0x27f   :  { %1376 = vpow2.f32 %v464_v21  ;;  %v1363_v21 = vpack.c.bf16 %v49_v20, %v48_v36 }
 0x285   :  { %v1375_v29 = vpop.eup %1374 }
 0x286   :  { %1164 = vmatprep.mubr.msk.f32.mxu0 %vm453_vm2, %v1375_v29 }
 0x289   :  { %v1377_v23 = vpop.eup %1376 }
 0x28a   :  { %1165 = vmatmul.mubr.msk.f32.vlgmr.msra.gmra.mrb[6].mxu0 %vm453_vm2, %v1377_v23 }
 0x28b   :  { %1310 = vmatpush3.bf16.msra.mxu0 %v1307_v31  ;;  %v1351_v31 = vpack.c.bf16 %v43_v30, %v42_v28  ;;  %v1016_v28 = vld [vmem:[%s1737_s1 + $0x147] ss:$0 sm:$0xff] }
 0x28c   :  { %1312 = vmatprep.subr.bf16.mxu0 %v1311_v32 }
 0x28f   :  { %1314 = vmatpush3.bf16.msra.mxu0 %v1311_v32  ;;  %v44_v32 = vld [vmem:[%s1737_s1 + $0xc0] sm:$0xff] }
 0x290   :  { %1316 = vmatprep.subr.bf16.mxu0 %v1315_v33 }
 0x293   :  { %1318 = vmatpush3.bf16.msra.mxu0 %v1315_v33  ;;  %v45_v33 = vld [vmem:[%s1737_s1 + $0xc8] sm:$0xff] }
 0x294   :  { %1320 = vmatprep.subr.bf16.mxu0 %v1319_v34 }
 0x297   :  { %1322 = vmatpush3.bf16.msra.mxu0 %v1319_v34  ;;  %v1355_v34 = vpack.c.bf16 %v45_v33, %v44_v32  ;;  %v1017_v33 = vld [vmem:[%s1737_s1 + $0x148] ss:$0 sm:$0xff] }
 0x298   :  { %1332 = vmatprep.subr.bf16.mxu0 %v1331_v7 }
 0x35d   :  { %v1166_v41 = vpop.f32.mrb[6].mxu0 }
 0x35e   :  { %v548_v42 = vmax.f32 %v1166_v41, 1e-30  ;;  %v538_v43 = vpop.f32.mrb[7].mxu0 }
 0x35f   :  { %v547_v44 = vmax.f32 %v538_v43, 1e-30 }
 0x360   :  { %1378 = vrcp.f32 %v548_v42  ;;  %v1011_v42 = vld [vmem:[%s1737_s1 + $0x145] ss:$0 sm:$0xff] }
 0x361   :  { %1380 = vrcp.f32 %v547_v44 }
 0x36a   :  { %v1379_v45 = vpop.eup %1378 }
 0x36b   :  { %v1381_v46 = vpop.eup %1380  ;;  %v552_v48 = vmul.f32 %v1379_v45, %v1377_v23 }
 0x36c   :  { %v551_v47 = vmul.f32 %v1381_v46, %v1375_v29 }
 0x36e   :  { %1183 = vmatprep.mubr.msk.f32.mxu0 %vm453_vm2, %v551_v47 }
 0x36f   :  { %1184 = vmatmul.mubr.msk.f32.vlgmr.msra.gmra.mrb[8].mxu0 %vm453_vm2, %v552_v48 }
 0x370   :  { %1334 = vmatpush3.bf16.msra.mxu0 %v1331_v7 }
 0x371   :  { %1336 = vmatprep.subr.bf16.mxu0 %v1335_v10 }
 0x374   :  { %1338 = vmatpush3.bf16.msra.mxu0 %v1335_v10 }
 0x442   :  { %v1185_v49 = vpop.f32.mrb[8].mxu0 }
 0x443   :  { %v625_v50 = vpop.f32.mrb[9].mxu0 }
 0x444   :  { %1194 = vmatprep.mubr.msk.f32.mxu1 %vm88_vm0, %v625_v50  ;;  %v51_v50 = vld [vmem:[%s1737_s1 + $0xf8] sm:$0xff] }
 0x445   :  { %1195 = vmatmul.mubr.msk.f32.vlgmr.msra.gmra.mrb[2].mxu1 %vm88_vm0, %v1185_v49  ;;  %v50_v49 = vld [vmem:[%s1737_s1 + $0xf0] sm:$0xff] }
 0x446   :  { %1342 = vmatpush3.bf16.msra.mxu1 %v1339_v15 }
 0x447   :  { %1344 = vmatprep.subr.bf16.mxu1 %v1343_v17 }
 0x44a   :  { %1346 = vmatpush3.bf16.msra.mxu1 %v1343_v17 }
 0x44b   :  { %1348 = vmatprep.subr.bf16.mxu1 %v1347_v25 }
 0x44e   :  { %1350 = vmatpush3.bf16.msra.mxu1 %v1347_v25 }
 0x44f   :  { %1352 = vmatprep.subr.bf16.mxu1 %v1351_v31 }
 0x452   :  { %1354 = vmatpush3.bf16.msra.mxu1 %v1351_v31 }
 0x453   :  { %1356 = vmatprep.subr.bf16.mxu1 %v1355_v34 }
 0x456   :  { %1358 = vmatpush3.bf16.msra.mxu1 %v1355_v34 }
 0x457   :  { %1360 = vmatprep.subr.bf16.mxu1 %v1359_v19 }
 0x45a   :  { %1362 = vmatpush3.bf16.msra.mxu1 %v1359_v19 }
 0x45b   :  { %1364 = vmatprep.subr.bf16.mxu1 %v1363_v21 }
 0x45e   :  { %1366 = vmatpush3.bf16.msra.mxu1 %v1363_v21 }
 0x518   :  { %v1196_v52 = vpop.f32.mrb[2].mxu1 }
 0x519   :  { %v710_v53 = vpop.f32.mrb[3].mxu1  ;;  %v716_v54 = vadd.f32 %v1196_v52, %v1007_v51  ;;  %v1012_v52 = vld [vmem:[%s1739_s3 + $0x20] ss:$0 sm:$0xff] }
 0x51a   :  { %v711_v55 = vadd.f32 %v1007_v51, %v710_v53  ;;  %v1367_v51 = vpack.c.bf16 %v51_v50, %v50_v49 }
 0x51b   :  { %v720_v58 = vadd.f32 %v716_v54, %v1476_v12 }
 0x51c   :  { %v719_v56 = vadd.f32 %v711_v55, %v1457_v5  ;;  %1368 = vmatprep.subr.bf16.mxu1 %v1367_v51 }
 0x51d   :  { %v724_v59 = vsel %vm88_vm0, %v720_v58, 0.0  ;;  %1370 = vmatpush3.bf16.msra.mxu1 %v1367_v51 }
 0x51e   :  { %v721_v57 = vsel %vm88_vm0, %v719_v56, 0.0 }
 0x51f   :  { %722 = vadd.xlane.f32.xlu1 %v721_v57 }
 0x523   :  { %725 = vadd.xlane.f32.xlu1 %v724_v59  ;;  %v1015_v59 = vld [vmem:[%s1737_s1 + $0x146] ss:$0 sm:$0xff] }
 0x5ac   :  { %v723_v60 = vpop.xlane.xlu1 %722 }
 0x5ad   :  { %v728_v61 = vmul.f32 0.03125, %v723_v60 }
 0x5af   :  { %v1626_v62 = vsub.f32 %v719_v56, %v728_v61 }
 0x5b0   :  { %v726_v63 = vpop.xlane.xlu1 %725 }
 0x5b1   :  { %v729_v0 = vmul.f32 0.03125, %v726_v63  ;;  %v732_v1 = vmul.f32 %v1626_v62, %v1626_v62 }
 0x5b3   :  { %v1630_v2 = vsub.f32 %v720_v58, %v729_v0  ;;  %v734_v5 = vsel %vm88_vm0, %v732_v1, 0.0 }
 0x5b4   :  { %735 = vadd.xlane.f32.xlu0 %v734_v5 }
 0x5b5   :  { %v733_v12 = vmul.f32 %v1630_v2, %v1630_v2 }
 0x5b7   :  { %v737_v3 = vsel %vm88_vm0, %v733_v12, 0.0 }
 0x5b8   :  { %738 = vadd.xlane.f32.xlu1 %v737_v3 }
 0x641   :  { %v736_v29 = vpop.xlane.xlu0 %735 }
 0x642   :  { %v740_v23 = vmul.f32 0.03125, %v736_v29 }
 0x644   :  { %v742_v26 = vadd.f32 1e-05, %v740_v23 }
 0x645   :  { %v739_v27 = vpop.xlane.xlu1 %738 }
 0x646   :  { %1382 = vrsqrt.f32 %v742_v26  ;;  %v741_v37 = vmul.f32 0.03125, %v739_v27 }
 0x648   :  { %v743_v38 = vadd.f32 1e-05, %v741_v37 }
 0x64a   :  { %1384 = vrsqrt.f32 %v743_v38 }
 0x650   :  { %v1383_v39 = vpop.eup %1382 }
 0x651   :  { %v746_v41 = vmul.f32 %v1383_v39, %v1626_v62 }
 0x653   :  { %v752_v43 = vmul.f32 %v1010_v40, %v746_v41 }
 0x654   :  { %v1385_v44 = vpop.eup %1384 }
 0x655   :  { %v747_v45 = vmul.f32 %v1385_v44, %v1630_v2  ;;  %v758_v46 = vadd.f32 %v1011_v42, %v752_v43 }
 0x657   :  { %v753_v47 = vmul.f32 %v1010_v40, %v747_v45  ;;  %1205 = vmatprep.mubr.msk.f32.mxu0 %vm88_vm0, %v758_v46 }
 0x659   :  { %v759_v48 = vadd.f32 %v1011_v42, %v753_v47 }
 0x65b   :  { %1206 = vmatmul.mubr.msk.f32.vlgmr.msra.gmra.mrb[10].mxu0 %vm88_vm0, %v759_v48 }
 0x72e   :  { %v1207_v53 = vpop.f32.mrb[10].mxu0 }
 0x72f   :  { %v842_v54 = vadd.f32 %v1207_v53, %v1012_v52  ;;  %v836_v55 = vpop.f32.mrb[11].mxu0 }
 0x730   :  { %v837_v56 = vadd.f32 %v1012_v52, %v836_v55 }
 0x731   :  { %v846_v58 = vmax.f32 %v842_v54, 0.0 }
 0x732   :  { %v845_v57 = vmax.f32 %v837_v56, 0.0 }
 0x734   :  { %1240 = vmatprep.mubr.f32.mxu1 %v845_v57 }
 0x735   :  { %1241 = vmatmul.mubr.f32.vlgmr.msra.gmra.mrb[4].mxu1 %v846_v58 }
 0x808   :  { %v1242_v60 = vpop.f32.mrb[4].mxu1 }
 0x809   :  { %v923_v61 = vadd.f32 %v1242_v60, %v1015_v59  ;;  %v917_v62 = vpop.f32.mrb[5].mxu1 }
 0x80a   :  { %v918_v63 = vadd.f32 %v1015_v59, %v917_v62 }
 0x80b   :  { %v927_v0 = vadd.f32 %v923_v61, %v759_v48 }
 0x80c   :  { %v926_v1 = vadd.f32 %v918_v63, %v758_v46 }
 0x80d   :  { %v931_v2 = vsel %vm88_vm0, %v927_v0, 0.0 }
 0x80e   :  { %932 = vadd.xlane.f32.xlu1 %v931_v2  ;;  %v928_v5 = vsel %vm88_vm0, %v926_v1, 0.0 }
 0x80f   :  { %929 = vadd.xlane.f32.xlu0 %v928_v5 }
 0x89b   :  { %v933_v12 = vpop.xlane.xlu1 %932 }
 0x89c   :  { %v935_v3 = vmul.f32 0.03125, %v933_v12  ;;  %v930_v4 = vpop.xlane.xlu0 %929 }
 0x89d   :  { %v934_v6 = vmul.f32 0.03125, %v930_v4 }
 0x89e   :  { %v937_v7 = vsub.f32 %v927_v0, %v935_v3 }
 0x89f   :  { %v936_v8 = vsub.f32 %v926_v1, %v934_v6 }
 0x8a0   :  { %v939_v9 = vmul.f32 %v937_v7, %v937_v7 }
 0x8a1   :  { %v938_v10 = vmul.f32 %v936_v8, %v936_v8 }
 0x8a2   :  { %v943_v11 = vsel %vm88_vm0, %v939_v9, 0.0 }
 0x8a3   :  { %944 = vadd.xlane.f32.xlu1 %v943_v11  ;;  %v940_v13 = vsel %vm88_vm0, %v938_v10, 0.0 }
 0x8a4   :  { %941 = vadd.xlane.f32.xlu0 %v940_v13 }
 0x930   :  { %v945_v14 = vpop.xlane.xlu1 %944 }
 0x931   :  { %v947_v15 = vmul.f32 0.03125, %v945_v14  ;;  %v942_v16 = vpop.xlane.xlu0 %941 }
 0x932   :  { %v946_v17 = vmul.f32 0.03125, %v942_v16 }
 0x933   :  { %v949_v18 = vadd.f32 1e-05, %v947_v15 }
 0x934   :  { %v948_v22 = vadd.f32 1e-05, %v946_v17 }
 0x935   :  { %1386 = vrsqrt.f32 %v949_v18 }
 0x936   :  { %1388 = vrsqrt.f32 %v948_v22 }
 0x93f   :  { %v1387_v25 = vpop.eup %1386 }
 0x940   :  { %v1389_v30 = vpop.eup %1388  ;;  %v953_v31 = vmul.f32 %v1387_v25, %v937_v7 }
 0x941   :  { %v952_v32 = vmul.f32 %v1389_v30, %v936_v8 }
 0x942   :  { %v959_v34 = vmul.f32 %v1016_v28, %v953_v31 }
 0x943   :  { %v958_v24 = vmul.f32 %v1016_v28, %v952_v32 }
 0x944   :  { %v965_v35 = vadd.f32 %v1017_v33, %v959_v34 }
 0x945   :  { %v964_v19 = vadd.f32 %v1017_v33, %v958_v24 }
 0x946   :  { %967 = vst.msk [vmem:[#allocation2 + $0x8] sm:$0xff] %vm88_vm0, %v965_v35 }
 0x947   :  { %966 = vst.msk [vmem:[#allocation2] sm:$0xff] %vm88_vm0, %v964_v19 }
 0x948   :  { %1401 = shalt.err (!%p1398_p4)
}
 0x949   :  { %s1402_s12 = scalar_lea.hbm %s1740_s4, 256 }
 0x94a   :  { %p1403_p5 = scmp.ne.s32.totalorder %s1740_s4, %s1402_s12  ;;  %p1406_p6 = scmp.lt.u32.totalorder %s1402_s12, %s1740_s4 }
 0x94c   :  { %p1408_p7 = pnand %p1406_p6, %p1403_p5 }
 0x94e   :  { %1411 = shalt.err (!%p1408_p7)
}
 0x94f   :  { %s1415_s17 = smov 128   ;;  %s1416_s18 = smov 8  }
 0x950   :  { %979 = dma.vmem_to_hbm [thread:$0]  %s974_s0, 256, %s1740_s4, [#allocation3], %s1415_s17, %s1415_s17, %s1416_s18  }
 0x951   :  { %1412 = dma.done.wait [#allocation3], 256  }
 0x952   :  { %1413 = vsyncadd [#allocation3], 4294967040 }
 0x953   :  { %983 = vsyncpa [#allocation3], 1 }

</bundles_post_ra>
